<compile_context>
chip_gen: v5e
topology: v5e:2x2
jax: 0.10.0
libtpu: 0.0.40
codegen_flags: <defaults>
</compile_context>

<pallas_src>
import jax
import jax.numpy as jnp
from jax.experimental import pallas as pl
from jax.experimental.pallas import tpu as pltpu


def generate_encoder(in_channels, max_len):
    """Mirror of the PyTorch generate_encoder (float32)."""
    pos = jnp.arange(max_len, dtype=jnp.float32)[:, None]        # (max_len, 1)
    i = jnp.arange(in_channels, dtype=jnp.float32)[None, :]      # (1, C)
    angle_rates = 1.0 / jnp.power(10000.0, 2.0 * jnp.floor(i / 2.0) / in_channels)
    pe = pos * angle_rates                                        # (max_len, C)
    pe = pe.at[:, 0::2].set(jnp.sin(pe[:, 0::2]))
    pe = pe.at[:, 1::2].set(jnp.cos(pe[:, 1::2]))
    return pe


# ---------------------------------------------------------------------------
# Kernels: pure VPU broadcast-adds; the problem is HBM-bandwidth bound.
# ---------------------------------------------------------------------------
def _pe_add_2d_kernel(x_ref, pe_ref, o_ref):
    # x/o: (TR, TL) tile of the flattened (B, T*C) input.
    # pe:  (1, TL) batch-invariant tile, broadcast along the sublane axis.
    o_ref[...] = x_ref[...] + pe_ref[...]


def _pe_add_3d_kernel(x_ref, pe_ref, o_ref):
    # x/o: (B, TR, TL) tile of the folded (B, G, (T//G)*C) input.
    # pe:  (TR, TL), broadcast along the leading batch dim (cheap vreg reuse).
    o_ref[...] = x_ref[...] + pe_ref[...][None, :, :]


# ---------------------------------------------------------------------------
# Tiling helpers
# ---------------------------------------------------------------------------
def _cdiv(a, b):
    return (a + b - 1) // b


def _round_up(a, b):
    return _cdiv(a, b) * b


def _sublane_pack(dtype):
    # f32 -> 8, bf16 -> 16, int8/fp8 -> 32 (sub-32-bit dtypes pack along sublanes).
    itemsize = jnp.dtype(dtype).itemsize
    return 8 * max(1, 4 // itemsize)


def _smallest_fold(T, S):
    """Smallest divisor G of T that is a multiple of S (None if no such divisor)."""
    for g in range(S, T + 1, S):
        if T % g == 0:
            return g
    return None


def _plan_tiles(rows, K, row_unit_bytes, S, target_bytes):
    """Pick (row_tile, lane_tile) for a (rows, K)-tiled layout.

    row_unit_bytes = bytes of x moved by ONE row of a full-width block
    (includes any leading batch multiplier).  row_tile is a multiple of S or
    the full row extent; lane_tile is a multiple of 128 or the full K extent.
    """
    full_row_group = S * row_unit_bytes          # one dense, full-width row group
    if full_row_group <= target_bytes:
        # Full-width (fully contiguous DMA) column tile; split rows toward target.
        lane_tile = K
        n_row = max(1, _cdiv(rows * row_unit_bytes, target_bytes))
        cap = max(S, (target_bytes // row_unit_bytes) // S * S)   # keep block <= target
        row_tile = min(rows, _round_up(_cdiv(rows, n_row), S), cap)
    else:
        # Even a minimal dense row group exceeds the budget: keep rows dense and
        # split columns into near-equal, 128-aligned tiles.
        row_tile = min(rows, S)
        n_col = max(1, _cdiv(full_row_group, target_bytes))
        lane_tile = min(K, _round_up(_cdiv(K, n_col), 128))
    # Ensure at least two grid steps when splittable so both v7x TensorCores
    # get work (both grid axes are marked "parallel").
    if _cdiv(rows, row_tile) * _cdiv(K, lane_tile) < 2:
        if rows >= 2 * S:
            row_tile = max(S, ((rows // 2) // S) * S)
        elif K >= 2 * 128:
            lane_tile = _round_up(_cdiv(K, 2), 128)
    return row_tile, lane_tile


# ---------------------------------------------------------------------------
# Forward wrapper
# ---------------------------------------------------------------------------
def position_encoder_1d(x, pe_table, *,
                        target_block_bytes=4 << 20,
                        min_pallas_bytes=1 << 20,
                        vmem_limit_bytes=32 << 20,
                        donate_x=False):
    """out = x + pe_table[:T][None, :, :] for x of shape (B, T, C).

    Eval-mode forward of PositionEncoder1D (dropout is identity).
    Set donate_x=True only when the caller donates x; it aliases the output
    with x's HBM buffer (footprint win; with a non-donated x XLA would insert
    a defensive copy, so it defaults to off).
    """
    B, T, C = x.shape
    assert T <= pe_table.shape[0], (
        f"sequence length {T} exceeds max_len {pe_table.shape[0]}")

    # TODO(synk): torch keeps position_encoder as an fp32 buffer and promotes the
    # add; here pe is cast to x.dtype (not bit-parity for bf16/fp8 inputs).
    pe = pe_table[:T, :].astype(x.dtype)

    itemsize = jnp.dtype(x.dtype).itemsize
    total_bytes = B * T * C * itemsize

    # Tiny problems: pallas_call dispatch plus ~0.35 us/grid-step overhead
    # dominates; a plain fused XLA add is strictly faster.
    if total_bytes < min_pallas_bytes:
        return x + pe[None, :, :]

    S = _sublane_pack(x.dtype)
    compiler_params = pltpu.CompilerParams(
        dimension_semantics=("parallel", "parallel"),
        vmem_limit_bytes=vmem_limit_bytes,
    )
    cost = pl.CostEstimate(
        flops=B * T * C,
        transcendentals=0,
        bytes_accessed=2 * total_bytes + T * C * itemsize,
    )
    io_alias = {0: 0} if donate_x else {}

    # If the batch is smaller than the sublane packing, fold a chunk of T into
    # the sublane axis so every vreg row is dense.
    G = None if B >= S else _smallest_fold(T, S)

    if G is None:
        # ---- 2D layout: (B, T*C); pe broadcast over the batch/sublane axis.
        K = T * C
        x2 = x.reshape(B, K)
        pe2 = pe.reshape(1, K)
        TR, TL = _plan_tiles(B, K, K * itemsize, S, target_block_bytes)
        # Columns outer, batch inner: the pe tile (column-only index) stays
        # resident across consecutive batch steps on each core.
        grid = (_cdiv(K, TL), _cdiv(B, TR))
        out2 = pl.pallas_call(
            _pe_add_2d_kernel,
            out_shape=jax.ShapeDtypeStruct((B, K), x.dtype),
            grid=grid,
            in_specs=[
                pl.BlockSpec((TR, TL), lambda j, i: (i, j)),   # x tile
                pl.BlockSpec((1, TL), lambda j, i: (0, j)),    # pe tile
            ],
            out_specs=pl.BlockSpec((TR, TL), lambda j, i: (i, j)),
            compiler_params=compiler_params,
            cost_estimate=cost,
            input_output_aliases=io_alias,
        )(x2, pe2)
        return out2.reshape(B, T, C)

    # ---- 3D folded layout: (B, G, (T//G)*C); pe is (G, (T//G)*C), broadcast
    # over the leading batch dim in-kernel.  The whole batch lives in every
    # block, so pe is streamed from HBM exactly once (traffic stays at floor).
    K = (T // G) * C
    x3 = x.reshape(B, G, K)
    pe3 = pe.reshape(G, K)
    TR, TL = _plan_tiles(G, K, B * K * itemsize, S, target_block_bytes)
    grid = (_cdiv(G, TR), _cdiv(K, TL))
    out3 = pl.pallas_call(
        _pe_add_3d_kernel,
        out_shape=jax.ShapeDtypeStruct((B, G, K), x.dtype),
        grid=grid,
        in_specs=[
            pl.BlockSpec((B, TR, TL), lambda g, j: (0, g, j)),  # x tile
            pl.BlockSpec((TR, TL), lambda g, j: (g, j)),        # pe tile
        ],
        out_specs=pl.BlockSpec((B, TR, TL), lambda g, j: (0, g, j)),
        compiler_params=compiler_params,
        cost_estimate=cost,
        input_output_aliases=io_alias,
    )(x3, pe3)
    return out3.reshape(B, T, C)


if __name__ == "__main__":
    MAX_LEN = 2000
    key = jax.random.PRNGKey(0)
    k0, k1, k2 = jax.random.split(key, 3)
    checks = []

    # 1) Module-sized small input (B, T, C) = (2, 8, 32): takes the plain-XLA
    #    fast path (a 2 KiB problem is pure dispatch overhead for a kernel).
    B, T, C = 2, 8, 32
    pe32 = generate_encoder(C, MAX_LEN)                      # fp32 buffer, as in __init__
    x = jax.random.normal(k0, (B, T, C), dtype=jnp.float32)
    out = jax.block_until_ready(position_encoder_1d(x, pe32))
    ref = x + pe32[None, :T, :]
    checks.append(out.shape == (B, T, C)
                  and bool(jnp.allclose(out, ref, atol=1e-6, rtol=1e-6)))

    # 2) Small-batch case (B < 8) exercising the folded 3D Pallas path.
    B, T, C = 4, 1600, 64
    pe64 = generate_encoder(C, MAX_LEN)
    x = jax.random.normal(k1, (B, T, C), dtype=jnp.float32)
    out = jax.block_until_ready(position_encoder_1d(x, pe64))
    ref = x + pe64[None, :T, :]
    checks.append(out.shape == (B, T, C)
                  and bool(jnp.allclose(out, ref, atol=1e-6, rtol=1e-6)))

    # 3) Batch >= 8 case exercising the lane-dense 2D Pallas path.
    B, T, C = 16, 1000, 32
    x = jax.random.normal(k2, (B, T, C), dtype=jnp.float32)
    out = jax.block_until_ready(position_encoder_1d(x, pe32))
    ref = x + pe32[None, :T, :]
    checks.append(out.shape == (B, T, C)
                  and bool(jnp.allclose(out, ref, atol=1e-6, rtol=1e-6)))

    assert all(checks), checks
    print("KERNEL_OK")
</pallas_src>

<mosaic_0001>
module attributes {stable_mosaic.version = 11 : i64} {
  func.func @_pe_add_3d_kernel(%arg0: i32, %arg1: i32, %arg2: memref<4x8x6400xf32, #tpu.memory_space<vmem>>, %arg3: memref<8x6400xf32, #tpu.memory_space<vmem>>, %arg4: memref<4x8x6400xf32, #tpu.memory_space<vmem>>) attributes {dimension_semantics = [#tpu.dimension_semantics<parallel>, #tpu.dimension_semantics<parallel>], iteration_bounds = array<i64: 1, 2>, scalar_prefetch = 0 : i64, scratch_operands = 0 : i64, tpu.core_type = #tpu.core_type<tc>, window_params = [{transform_indices = @transform_0, window_bounds = array<i64: 4, 8, 6400>}, {transform_indices = @transform_1, window_bounds = array<i64: 8, 6400>}, {transform_indices = @transform_2, window_bounds = array<i64: 4, 8, 6400>}]} {
    %c0 = arith.constant 0 : index
    %c0_0 = arith.constant 0 : index
    %c0_1 = arith.constant 0 : index
    %0 = vector.load %arg2[%c0, %c0_0, %c0_1] : memref<4x8x6400xf32, #tpu.memory_space<vmem>>, vector<4x8x6400xf32>
    %c0_2 = arith.constant 0 : index
    %c0_3 = arith.constant 0 : index
    %1 = vector.load %arg3[%c0_2, %c0_3] : memref<8x6400xf32, #tpu.memory_space<vmem>>, vector<8x6400xf32>
    %2 = vector.shape_cast %1 : vector<8x6400xf32> to vector<1x8x6400xf32>
    %3 = vector.broadcast %2 : vector<1x8x6400xf32> to vector<4x8x6400xf32>
    %4 = arith.addf %0, %3 : vector<4x8x6400xf32>
    %c0_4 = arith.constant 0 : index
    %c0_5 = arith.constant 0 : index
    %c0_6 = arith.constant 0 : index
    %5 = vector.load %arg4[%c0_4, %c0_5, %c0_6] : memref<4x8x6400xf32, #tpu.memory_space<vmem>>, vector<4x8x6400xf32>
    tpu.vector_store %arg4[%c0_4, %c0_5, %c0_6], %4 {strides = array<i32>} : memref<4x8x6400xf32, #tpu.memory_space<vmem>>, vector<4x8x6400xf32>,
    return
  }
  func.func @transform_0(%arg0: i32, %arg1: i32) -> (i32, i32, i32) {
    %c0_i32 = arith.constant 0 : i32
    %c0_i32_0 = arith.constant 0 : i32
    return %c0_i32, %arg0, %arg1 : i32, i32, i32
  }
  func.func @transform_1(%arg0: i32, %arg1: i32) -> (i32, i32) {
    %c0_i32 = arith.constant 0 : i32
    return %arg0, %arg1 : i32, i32
  }
  func.func @transform_2(%arg0: i32, %arg1: i32) -> (i32, i32, i32) {
    %c0_i32 = arith.constant 0 : i32
    %c0_i32_0 = arith.constant 0 : i32
    return %c0_i32, %arg0, %arg1 : i32, i32, i32
  }
}

</mosaic_0001>

<bundles_post_ra>
// kernel: tpu_custom_call.1
= control target key start
LH: loop header
LB: loop body
LE: loop exit
PB: predicated region body
PF: predicated region fallthrough
CT: control target
= control target key end

     0   :  { %7 = vsyncpa [#allocation3], 0  ;;  %s2163_s0 = inlined_call_operand.hbm [shape: f32[4,8,12800], index: 0, kind: input, shape index: {}]   ;;  %s2164_s1 = inlined_call_operand.hbm [shape: f32[8,12800], index: 1, kind: input, shape index: {}]   ;;  %s2165_s2 = inlined_call_operand.hbm [shape: f32[4,8,12800], index: 2, kind: output, shape index: {}]  }
   0x1   :  { %9 = vsyncpa [#allocation3 + $0x1], 0 }
   0x2   :  { %10 = vsyncpa [#allocation6], 0 }
   0x3   :  { %12 = vsyncpa [#allocation6 + $0x1], 0 }
   0x4   :  { %13 = vsyncpa [#allocation4], 0 }
   0x5   :  { %15 = vsyncpa [#allocation4 + $0x1], 0  ;;  %s1269_s9 = smov 0   ;;  %s1271_s10 = smov 0  }
   0x6   :  { %s1273_s11 = smov 0   ;;  %s1275_s12 = smov 0  }
   0x7   :  { %s1277_s13 = smov 0   ;;  %s1279_s14 = smov 0  }
   0x8 LB: > { %s1010_s15 = sadd.s32 4294967295, %s1246_s14   ;;  %s1011_s16 = sadd.s32 4294967294, %s1246_s14   ;;  %s1246_s14 = sphi %s1279_s14, %s21_s14   ;;  %s1242_s13 = sphi %s1277_s13, %s2175_s13   ;;  %s1238_s12 = sphi %s1275_s12, %s2174_s12   ;;  %s1234_s11 = sphi %s1273_s11, %s2173_s11   ;;  %s1230_s10 = sphi %s1271_s10, %s2172_s10   ;;  %s1226_s9 = sphi %s1269_s9, %s2171_s9  }
   0x9   : > { %s30_s17 = sadd.s32 1, %s1242_s13  ;;  %s42_s18 = sadd.s32 1, %s1234_s11 }
   0xa   : > { %p31_p0 = scmp.ge.s32.totalorder %s30_s17, 2  ;;  %p49_p1 = scmp.ne.s32.totalorder %s1234_s11, %s1230_s10 }
   0xb   : > { %p50_p2 = scmp.eq.s32.totalorder %s1246_s14, 0  ;;  %p55_p3 = scmp.ne.s32.totalorder %s1230_s10, %s1226_s9 }
   0xc   : > { %s2177_s17 = smov (%p31_p0, %s30_s17), 0  ;;  %p56_p5 = scmp.eq.s32.totalorder %s1010_s15, 0 }
   0xd   : > { %p1310_p4 = por %p50_p2, %p49_p1  ;;  %s38_s20 = ssub.s32 %s1242_s13, %s2177_s17 }
   0xe   : > { %p109_p6 = scmp.eq.s32.totalorder %s1010_s15, 1  ;;  %p40_p7 = scmp.eq.s32.totalorder %s38_s20, 0 }
   0xf   : > { %p1316_p8 = por %p56_p5, %p55_p3  ;;  %p115_p10 = scmp.eq.s32.totalorder %s1011_s16, 1 }
  0x10   : > { %p1320_p9 = por %p109_p6, %p49_p1  ;;  %p1013_p12 = scmp.ge.s32.totalorder %s1246_s14, 2 }
  0x11   : > { %s1325_s23 = scalar_select %p40_p7, %s1234_s11, %s42_s18  }
  0x12   : > { %p1327_p11 = por %p115_p10, %p55_p3  ;;  %p1044_p13 = scmp.lt.s32.totalorder %s1246_s14, 2 }
  0x13   : > { %s135_s25 = sand.u32 1, %s1234_s11   ;;  %s1020_s27 = smul.u32 400, %s1242_s13 }
  0x14   : > { %s1023_s26 = smul.u32 1600, %s135_s25  ;;  %p1337_p0 = pnand %p1044_p13, %p1310_p4 }
  0x15   : > { %s146_s3 = scalar_lea.hbm %s2163_s0, %s1020_s27  ;;  %s136_s7 = scalar_lea.sflag [#allocation3], %s135_s25 }
  0x16   : > { %s139_s4 = scalar_lea.vmem [#allocation2], %s1023_s26  ;;  %s147_s6 = sshll.u32 %s146_s3, 4  ;;  %s148_s6 = int_to_ptr.hbm [resolvable:$true] %s147_s6 }
  0x17   : > { %s149_s5 = sshll.u32 %s139_s4, 4  ;;  %s1248_s8 = smov 12800   ;;  %s150_s5 = int_to_ptr.vmem [resolvable:$true] %s149_s5 }
  0x18   : > { %s1249_s15 = smov 6400   ;;  %s1250_s16 = smov 400  }
  0x19   : > { %1036 = dma.hbm_to_vmem [thread:$0]  (!%p1337_p0), %s148_s6, 25600, %s150_s5, %s136_s7, %s1248_s8, %s1249_s15, %s1250_s16  }
  0x1a   : > { %p1016_p1 = scmp.ge.s32.totalorder %s1246_s14, 1  ;;  %p179_p2 = scmp.lt.s32.totalorder %s1246_s14, 3 }
  0x1b   : > { %s1024_s18 = smul.u32 400, %s135_s25  ;;  %s170_s29 = scalar_lea.hbm %s2164_s1, %s1020_s27 }
  0x1c   : > { %p180_p3 = pnand %p1016_p1, %p179_p2  ;;  %s172_s26 = sshll.u32 %s170_s29, 4  ;;  %s173_s26 = int_to_ptr.hbm [resolvable:$true] %s172_s26 }
  0x1d   : > { %s163_s30 = scalar_lea.vmem [#allocation5], %s1024_s18  ;;  %s160_s4 = scalar_lea.sflag [#allocation6], %s135_s25 }
  0x1e   : > { %s174_s3 = sshll.u32 %s163_s30, 4  ;;  %183 = sbr.rel (%p180_p3) target bundleno = 249 (0xf9), region = 28  ;;  %s175_s3 = int_to_ptr.vmem [resolvable:$true] %s174_s3 }
  0x1f   : > { %1039 = dma.hbm_to_vmem [thread:$0]  (!%p1337_p0), %s173_s26, 6400, %s175_s3, %s160_s4  }
  0x20   : > { %s1354_s5 = sand.u32 (!%p180_p3), 1, %s1230_s10  }
  0x21   : > { %s1025_s6 = smul.u32 (!%p180_p3), 1600, %s1354_s5  ;;  %s186_s7 = scalar_lea.sflag (!%p180_p3), [#allocation3], %s1354_s5 }
  0x23   : > { %s1358_s8 = scalar_lea.vmem [#allocation2], %s1025_s6 }
  0x24   : > { %1213 = dma.done.wait (%p1316_p8), %s186_s7, 25600  }
  0x25   : > { %1215 = vsyncadd (%p1316_p8), %s186_s7, 4294941696  ;;  %s1026_s25 = smul.u32 400, %s1354_s5  ;;  %s196_s27 = scalar_lea.sflag [#allocation6], %s1354_s5 }
  0x27   : > { %s1366_s28 = scalar_lea.vmem [#allocation5], %s1026_s25 }
  0x28   : > { %1217 = dma.done.wait (%p1316_p8), %s196_s27, 6400  }
  0x29   : > { %1219 = vsyncadd (%p1316_p8), %s196_s27, 4294960896  ;;  %v229_v0 = vld [vmem:[%s1358_s8] sm:$0xff]  ;;  %v230_v2 = vld [vmem:[%s1358_s8 + $0x8] sm:$0xff]  ;;  %s1392_s21 = scalar_lea.vmem [#allocation7], %s1025_s6  ;;  %s1022_s15 = smul.u32 400, %s1238_s12 }
  0x2a   : > { %v1374_v1 = vld [vmem:[%s1366_s28] sm:$0xff]  ;;  %v1379_v4 = vld [vmem:[%s1366_s28 + $0x8] sm:$0xff]  ;;  %v1383_v6 = vld [vmem:[%s1366_s28 + $0x10] sm:$0xff]  ;;  %s894_s19 = sshll.u32 %s1392_s21, 4  ;;  %s880_s29 = scalar_lea.sflag [#allocation4], %s1354_s5  ;;  %s895_s19 = int_to_ptr.vmem [resolvable:$true] %s894_s19 }
  0x2b   : > { %v479_v3 = vadd.f32 %v1374_v1, %v229_v0  ;;  %v231_v5 = vld [vmem:[%s1358_s8 + $0x10] sm:$0xff]  ;;  %v480_v7 = vadd.f32 %v1379_v4, %v230_v2  ;;  %v232_v9 = vld [vmem:[%s1358_s8 + $0x18] sm:$0xff]  ;;  %v233_v11 = vld [vmem:[%s1358_s8 + $0x20] sm:$0xff]  ;;  %s893_s18 = scalar_lea.hbm %s2165_s2, %s1022_s15  ;;  %s1180_s6 = scalar_lea.hbm %s2165_s2, 3200 }
  0x2c   : > { %v481_v8 = vadd.f32 %v1383_v6, %v231_v5  ;;  %v1389_v10 = vld [vmem:[%s1366_s28 + $0x18] sm:$0xff]  ;;  %v1397_v13 = vld [vmem:[%s1366_s28 + $0x20] sm:$0xff]  ;;  %v1401_v15 = vld [vmem:[%s1366_s28 + $0x28] sm:$0xff]  ;;  %s896_s20 = sshll.u32 %s893_s18, 4  ;;  %s897_s20 = int_to_ptr.hbm [resolvable:$true] %s896_s20 }
  0x2d   : > { %679 = vst [vmem:[%s1392_s21] sm:$0xff] %v479_v3  ;;  %v482_v12 = vadd.f32 %v1389_v10, %v232_v9  ;;  %v234_v14 = vld [vmem:[%s1358_s8 + $0x28] sm:$0xff]  ;;  %v483_v16 = vadd.f32 %v1397_v13, %v233_v11  ;;  %v235_v18 = vld [vmem:[%s1358_s8 + $0x30] sm:$0xff]  ;;  %v236_v20 = vld [vmem:[%s1358_s8 + $0x38] sm:$0xff]  ;;  %s1174_s26 = sshra.s32 %s897_s20, 4  ;;  %s1175_s26 = int_to_ptr.hbm [resolvable:$true] %s1174_s26 }
  0x2e   : > { %680 = vst [vmem:[%s1392_s21 + $0x8] sm:$0xff] %v480_v7  ;;  %v484_v17 = vadd.f32 %v1401_v15, %v234_v14  ;;  %v1408_v19 = vld [vmem:[%s1366_s28 + $0x30] sm:$0xff]  ;;  %v1414_v22 = vld [vmem:[%s1366_s28 + $0x38] sm:$0xff]  ;;  %v1418_v24 = vld [vmem:[%s1366_s28 + $0x40] sm:$0xff]  ;;  %s1176_s30 = scalar_lea.hbm %s1175_s26, 1600  ;;  %p1181_p7 = scmp.lt.s32.totalorder %s1175_s26, %s2165_s2 }
  0x2f   : > { %681 = vst [vmem:[%s1392_s21 + $0x10] sm:$0xff] %v481_v8  ;;  %v485_v21 = vadd.f32 %v1408_v19, %v235_v18  ;;  %v237_v23 = vld [vmem:[%s1358_s8 + $0x40] sm:$0xff]  ;;  %v486_v25 = vadd.f32 %v1414_v22, %v236_v20  ;;  %v238_v26 = vld [vmem:[%s1358_s8 + $0x48] sm:$0xff]  ;;  %v239_v28 = vld [vmem:[%s1358_s8 + $0x50] sm:$0xff]  ;;  %p1177_p4 = scmp.ne.s32.totalorder %s1175_s26, %s1176_s30  ;;  %p1182_p8 = scmp.lt.s32.totalorder %s1180_s6, %s1176_s30 }
  0x30   : > { %682 = vst [vmem:[%s1392_s21 + $0x18] sm:$0xff] %v482_v12  ;;  %v1424_v27 = vld [vmem:[%s1366_s28 + $0x48] sm:$0xff]  ;;  %v487_v29 = vadd.f32 %v1418_v24, %v237_v23  ;;  %v1430_v30 = vld [vmem:[%s1366_s28 + $0x50] sm:$0xff]  ;;  %v1434_v32 = vld [vmem:[%s1366_s28 + $0x58] sm:$0xff] }
  0x31   : > { %683 = vst [vmem:[%s1392_s21 + $0x20] sm:$0xff] %v483_v16  ;;  %v240_v31 = vld [vmem:[%s1358_s8 + $0x58] sm:$0xff]  ;;  %v488_v33 = vadd.f32 %v1424_v27, %v238_v26  ;;  %v241_v34 = vld [vmem:[%s1358_s8 + $0x60] sm:$0xff]  ;;  %v489_v36 = vadd.f32 %v1430_v30, %v239_v28  ;;  %v242_v37 = vld [vmem:[%s1358_s8 + $0x68] sm:$0xff]  ;;  %p1178_p5 = pnand %p1177_p4, %p1320_p9  ;;  %p1183_p10 = por %p1182_p8, %p1181_p7 }
  0x32   : > { %684 = vst [vmem:[%s1392_s21 + $0x28] sm:$0xff] %v484_v17  ;;  %v1440_v35 = vld [vmem:[%s1366_s28 + $0x60] sm:$0xff]  ;;  %v1446_v38 = vld [vmem:[%s1366_s28 + $0x68] sm:$0xff]  ;;  %v490_v39 = vadd.f32 %v1434_v32, %v240_v31  ;;  %v1452_v41 = vld [vmem:[%s1366_s28 + $0x70] sm:$0xff] }
  0x33   : > { %685 = vst [vmem:[%s1392_s21 + $0x30] sm:$0xff] %v485_v21  ;;  %v243_v40 = vld [vmem:[%s1358_s8 + $0x70] sm:$0xff]  ;;  %v491_v42 = vadd.f32 %v1440_v35, %v241_v34  ;;  %v244_v43 = vld [vmem:[%s1358_s8 + $0x78] sm:$0xff]  ;;  %v492_v45 = vadd.f32 %v1446_v38, %v242_v37  ;;  %v245_v46 = vld [vmem:[%s1358_s8 + $0x80] sm:$0xff]  ;;  %p1179_p6 = pneg %p1178_p5 }
  0x34   : > { %686 = vst [vmem:[%s1392_s21 + $0x38] sm:$0xff] %v486_v25  ;;  %v1458_v44 = vld [vmem:[%s1366_s28 + $0x78] sm:$0xff]  ;;  %v1464_v47 = vld [vmem:[%s1366_s28 + $0x80] sm:$0xff]  ;;  %v493_v48 = vadd.f32 %v1452_v41, %v243_v40  ;;  %v1470_v50 = vld [vmem:[%s1366_s28 + $0x88] sm:$0xff] }
  0x35   : > { %687 = vst [vmem:[%s1392_s21 + $0x40] sm:$0xff] %v487_v29  ;;  %v246_v49 = vld [vmem:[%s1358_s8 + $0x88] sm:$0xff]  ;;  %v494_v51 = vadd.f32 %v1458_v44, %v244_v43  ;;  %v247_v52 = vld [vmem:[%s1358_s8 + $0x90] sm:$0xff]  ;;  %v495_v54 = vadd.f32 %v1464_v47, %v245_v46  ;;  %v248_v55 = vld [vmem:[%s1358_s8 + $0x98] sm:$0xff]  ;;  %p1184_p13 = pnand %p1183_p10, %p1179_p6 }
  0x36   : > { %688 = vst [vmem:[%s1392_s21 + $0x48] sm:$0xff] %v488_v33  ;;  %v1476_v53 = vld [vmem:[%s1366_s28 + $0x90] sm:$0xff]  ;;  %v1482_v56 = vld [vmem:[%s1366_s28 + $0x98] sm:$0xff]  ;;  %v496_v57 = vadd.f32 %v1470_v50, %v246_v49  ;;  %v1488_v59 = vld [vmem:[%s1366_s28 + $0xa0] sm:$0xff] }
  0x37   : > { %689 = vst [vmem:[%s1392_s21 + $0x50] sm:$0xff] %v489_v36  ;;  %v249_v58 = vld [vmem:[%s1358_s8 + $0xa0] sm:$0xff]  ;;  %v497_v60 = vadd.f32 %v1476_v53, %v247_v52  ;;  %v250_v61 = vld [vmem:[%s1358_s8 + $0xa8] sm:$0xff]  ;;  %v498_v63 = vadd.f32 %v1482_v56, %v248_v55  ;;  %v251_v0 = vld [vmem:[%s1358_s8 + $0xb0] sm:$0xff] }
  0x38   : > { %690 = vst [vmem:[%s1392_s21 + $0x58] sm:$0xff] %v490_v39  ;;  %v1494_v62 = vld [vmem:[%s1366_s28 + $0xa8] sm:$0xff]  ;;  %v1500_v2 = vld [vmem:[%s1366_s28 + $0xb0] sm:$0xff]  ;;  %v499_v3 = vadd.f32 %v1488_v59, %v249_v58  ;;  %v1506_v7 = vld [vmem:[%s1366_s28 + $0xb8] sm:$0xff] }
  0x39   : > { %691 = vst [vmem:[%s1392_s21 + $0x60] sm:$0xff] %v491_v42  ;;  %v252_v5 = vld [vmem:[%s1358_s8 + $0xb8] sm:$0xff]  ;;  %v500_v8 = vadd.f32 %v1494_v62, %v250_v61  ;;  %v253_v9 = vld [vmem:[%s1358_s8 + $0xc0] sm:$0xff]  ;;  %v501_v12 = vadd.f32 %v1500_v2, %v251_v0  ;;  %v254_v14 = vld [vmem:[%s1358_s8 + $0xc8] sm:$0xff] }
  0x3a   : > { %692 = vst [vmem:[%s1392_s21 + $0x68] sm:$0xff] %v492_v45  ;;  %v1512_v11 = vld [vmem:[%s1366_s28 + $0xc0] sm:$0xff]  ;;  %v1518_v16 = vld [vmem:[%s1366_s28 + $0xc8] sm:$0xff]  ;;  %v502_v17 = vadd.f32 %v1506_v7, %v252_v5  ;;  %v1524_v20 = vld [vmem:[%s1366_s28 + $0xd0] sm:$0xff] }
  0x3b   : > { %693 = vst [vmem:[%s1392_s21 + $0x70] sm:$0xff] %v493_v48  ;;  %v255_v18 = vld [vmem:[%s1358_s8 + $0xd0] sm:$0xff]  ;;  %v503_v21 = vadd.f32 %v1512_v11, %v253_v9  ;;  %v256_v23 = vld [vmem:[%s1358_s8 + $0xd8] sm:$0xff]  ;;  %v504_v26 = vadd.f32 %v1518_v16, %v254_v14  ;;  %v257_v28 = vld [vmem:[%s1358_s8 + $0xe0] sm:$0xff] }
  0x3c   : > { %694 = vst [vmem:[%s1392_s21 + $0x78] sm:$0xff] %v494_v51  ;;  %v1530_v25 = vld [vmem:[%s1366_s28 + $0xd8] sm:$0xff]  ;;  %v1536_v29 = vld [vmem:[%s1366_s28 + $0xe0] sm:$0xff]  ;;  %v505_v31 = vadd.f32 %v1524_v20, %v255_v18  ;;  %v1542_v34 = vld [vmem:[%s1366_s28 + $0xe8] sm:$0xff] }
  0x3d   : > { %695 = vst [vmem:[%s1392_s21 + $0x80] sm:$0xff] %v495_v54  ;;  %v258_v33 = vld [vmem:[%s1358_s8 + $0xe8] sm:$0xff]  ;;  %v506_v36 = vadd.f32 %v1530_v25, %v256_v23  ;;  %v259_v37 = vld [vmem:[%s1358_s8 + $0xf0] sm:$0xff]  ;;  %v507_v40 = vadd.f32 %v1536_v29, %v257_v28  ;;  %v260_v42 = vld [vmem:[%s1358_s8 + $0xf8] sm:$0xff] }
  0x3e   : > { %696 = vst [vmem:[%s1392_s21 + $0x88] sm:$0xff] %v496_v57  ;;  %v1548_v39 = vld [vmem:[%s1366_s28 + $0xf0] sm:$0xff]  ;;  %v1554_v43 = vld [vmem:[%s1366_s28 + $0xf8] sm:$0xff]  ;;  %v508_v45 = vadd.f32 %v1542_v34, %v258_v33  ;;  %v1560_v48 = vld [vmem:[%s1366_s28 + $0x100] sm:$0xff] }
  0x3f   : > { %697 = vst [vmem:[%s1392_s21 + $0x90] sm:$0xff] %v497_v60  ;;  %v261_v46 = vld [vmem:[%s1358_s8 + $0x100] sm:$0xff]  ;;  %v509_v49 = vadd.f32 %v1548_v39, %v259_v37  ;;  %v262_v51 = vld [vmem:[%s1358_s8 + $0x108] sm:$0xff]  ;;  %v510_v54 = vadd.f32 %v1554_v43, %v260_v42  ;;  %v263_v55 = vld [vmem:[%s1358_s8 + $0x110] sm:$0xff] }
  0x40   : > { %698 = vst [vmem:[%s1392_s21 + $0x98] sm:$0xff] %v498_v63  ;;  %v1566_v52 = vld [vmem:[%s1366_s28 + $0x108] sm:$0xff]  ;;  %v1572_v57 = vld [vmem:[%s1366_s28 + $0x110] sm:$0xff]  ;;  %v511_v58 = vadd.f32 %v1560_v48, %v261_v46  ;;  %v1578_v61 = vld [vmem:[%s1366_s28 + $0x118] sm:$0xff] }
  0x41   : > { %699 = vst [vmem:[%s1392_s21 + $0xa0] sm:$0xff] %v499_v3  ;;  %v264_v60 = vld [vmem:[%s1358_s8 + $0x118] sm:$0xff]  ;;  %v512_v63 = vadd.f32 %v1566_v52, %v262_v51  ;;  %v265_v0 = vld [vmem:[%s1358_s8 + $0x120] sm:$0xff]  ;;  %v513_v5 = vadd.f32 %v1572_v57, %v263_v55  ;;  %v267_v14 = vld [vmem:[%s1358_s8 + $0x130] sm:$0xff] }
  0x42   : > { %700 = vst [vmem:[%s1392_s21 + $0xa8] sm:$0xff] %v500_v8  ;;  %v1584_v3 = vld [vmem:[%s1366_s28 + $0x120] sm:$0xff]  ;;  %v266_v8 = vld [vmem:[%s1358_s8 + $0x128] sm:$0xff] }
  0x43   : > { %701 = vst [vmem:[%s1392_s21 + $0xb0] sm:$0xff] %v501_v12  ;;  %v1590_v9 = vld [vmem:[%s1366_s28 + $0x128] sm:$0xff]  ;;  %v514_v12 = vadd.f32 %v1578_v61, %v264_v60  ;;  %v515_v18 = vadd.f32 %v1584_v3, %v265_v0  ;;  %v1602_v23 = vld [vmem:[%s1366_s28 + $0x138] sm:$0xff]  ;;  %v269_v28 = vld [vmem:[%s1358_s8 + $0x140] sm:$0xff] }
  0x44   : > { %702 = vst [vmem:[%s1392_s21 + $0xb8] sm:$0xff] %v502_v17  ;;  %v1596_v17 = vld [vmem:[%s1366_s28 + $0x130] sm:$0xff]  ;;  %v1614_v37 = vld [vmem:[%s1366_s28 + $0x148] sm:$0xff]  ;;  %v1626_v51 = vld [vmem:[%s1366_s28 + $0x158] sm:$0xff] }
  0x45   : > { %703 = vst [vmem:[%s1392_s21 + $0xc0] sm:$0xff] %v503_v21  ;;  %v268_v21 = vld [vmem:[%s1358_s8 + $0x138] sm:$0xff]  ;;  %v517_v33 = vadd.f32 %v1596_v17, %v267_v14  ;;  %v271_v42 = vld [vmem:[%s1358_s8 + $0x150] sm:$0xff]  ;;  %v273_v55 = vld [vmem:[%s1358_s8 + $0x160] sm:$0xff] }
  0x46   : > { %704 = vst [vmem:[%s1392_s21 + $0xc8] sm:$0xff] %v504_v26  ;;  %v516_v26 = vadd.f32 %v1590_v9, %v266_v8  ;;  %v1638_v0 = vld [vmem:[%s1366_s28 + $0x168] sm:$0xff]  ;;  %v275_v8 = vld [vmem:[%s1358_s8 + $0x170] sm:$0xff] }
  0x47   : > { %705 = vst [vmem:[%s1392_s21 + $0xd0] sm:$0xff] %v505_v31  ;;  %v1608_v31 = vld [vmem:[%s1366_s28 + $0x140] sm:$0xff] }
  0x48   : > { %706 = vst [vmem:[%s1392_s21 + $0xd8] sm:$0xff] %v506_v36  ;;  %v270_v36 = vld [vmem:[%s1358_s8 + $0x148] sm:$0xff]  ;;  %v519_v46 = vadd.f32 %v1608_v31, %v269_v28  ;;  %v277_v28 = vld [vmem:[%s1358_s8 + $0x180] sm:$0xff] }
  0x49   : > { %707 = vst [vmem:[%s1392_s21 + $0xe0] sm:$0xff] %v507_v40  ;;  %v518_v40 = vadd.f32 %v1602_v23, %v268_v21  ;;  %v1650_v21 = vld [vmem:[%s1366_s28 + $0x178] sm:$0xff] }
  0x4a   : > { %708 = vst [vmem:[%s1392_s21 + $0xe8] sm:$0xff] %v508_v45  ;;  %v1620_v45 = vld [vmem:[%s1366_s28 + $0x150] sm:$0xff] }
  0x4b   : > { %709 = vst [vmem:[%s1392_s21 + $0xf0] sm:$0xff] %v509_v49  ;;  %v272_v49 = vld [vmem:[%s1358_s8 + $0x158] sm:$0xff]  ;;  %v521_v60 = vadd.f32 %v1620_v45, %v271_v42 }
  0x4c   : > { %710 = vst [vmem:[%s1392_s21 + $0xf8] sm:$0xff] %v510_v54  ;;  %v520_v54 = vadd.f32 %v1614_v37, %v270_v36  ;;  %v1662_v42 = vld [vmem:[%s1366_s28 + $0x188] sm:$0xff] }
  0x4d   : > { %711 = vst [vmem:[%s1392_s21 + $0x100] sm:$0xff] %v511_v58  ;;  %v1632_v58 = vld [vmem:[%s1366_s28 + $0x160] sm:$0xff] }
  0x4e   : > { %712 = vst [vmem:[%s1392_s21 + $0x108] sm:$0xff] %v512_v63  ;;  %v274_v63 = vld [vmem:[%s1358_s8 + $0x168] sm:$0xff]  ;;  %v523_v14 = vadd.f32 %v1632_v58, %v273_v55  ;;  %v280_v55 = vld [vmem:[%s1358_s8 + $0x198] sm:$0xff] }
  0x4f   : > { %713 = vst [vmem:[%s1392_s21 + $0x110] sm:$0xff] %v513_v5  ;;  %v522_v5 = vadd.f32 %v1626_v51, %v272_v49  ;;  %v279_v49 = vld [vmem:[%s1358_s8 + $0x190] sm:$0xff] }
  0x50   : > { %714 = vst [vmem:[%s1392_s21 + $0x118] sm:$0xff] %v514_v12  ;;  %v1644_v12 = vld [vmem:[%s1366_s28 + $0x170] sm:$0xff] }
  0x51   : > { %715 = vst [vmem:[%s1392_s21 + $0x120] sm:$0xff] %v515_v18  ;;  %v276_v18 = vld [vmem:[%s1358_s8 + $0x178] sm:$0xff]  ;;  %v525_v36 = vadd.f32 %v1644_v12, %v275_v8  ;;  %v282_v8 = vld [vmem:[%s1358_s8 + $0x1a8] sm:$0xff] }
  0x52   : > { %716 = vst [vmem:[%s1392_s21 + $0x128] sm:$0xff] %v516_v26  ;;  %v524_v26 = vadd.f32 %v1638_v0, %v274_v63  ;;  %v281_v63 = vld [vmem:[%s1358_s8 + $0x1a0] sm:$0xff] }
  0x53   : > { %717 = vst [vmem:[%s1392_s21 + $0x130] sm:$0xff] %v517_v33  ;;  %v1656_v33 = vld [vmem:[%s1366_s28 + $0x180] sm:$0xff] }
  0x54   : > { %718 = vst [vmem:[%s1392_s21 + $0x138] sm:$0xff] %v518_v40  ;;  %v278_v40 = vld [vmem:[%s1358_s8 + $0x188] sm:$0xff] }
  0x55   : > { %719 = vst [vmem:[%s1392_s21 + $0x140] sm:$0xff] %v519_v46  ;;  %v526_v46 = vadd.f32 %v1650_v21, %v276_v18  ;;  %v283_v18 = vld [vmem:[%s1358_s8 + $0x1b0] sm:$0xff] }
  0x56   : > { %720 = vst [vmem:[%s1392_s21 + $0x148] sm:$0xff] %v520_v54  ;;  %v527_v54 = vadd.f32 %v1656_v33, %v277_v28  ;;  %v284_v28 = vld [vmem:[%s1358_s8 + $0x1b8] sm:$0xff] }
  0x57   : > { %721 = vst [vmem:[%s1392_s21 + $0x150] sm:$0xff] %v521_v60  ;;  %v528_v60 = vadd.f32 %v1662_v42, %v278_v40  ;;  %v285_v40 = vld [vmem:[%s1358_s8 + $0x1c0] sm:$0xff] }
  0x58   : > { %722 = vst [vmem:[%s1392_s21 + $0x158] sm:$0xff] %v522_v5  ;;  %v529_v5 = vadd.f32 %v1374_v1, %v279_v49  ;;  %v286_v49 = vld [vmem:[%s1358_s8 + $0x1c8] sm:$0xff] }
  0x59   : > { %723 = vst [vmem:[%s1392_s21 + $0x160] sm:$0xff] %v523_v14  ;;  %v530_v14 = vadd.f32 %v1379_v4, %v280_v55  ;;  %v287_v55 = vld [vmem:[%s1358_s8 + $0x1d0] sm:$0xff] }
  0x5a   : > { %724 = vst [vmem:[%s1392_s21 + $0x168] sm:$0xff] %v524_v26  ;;  %v531_v26 = vadd.f32 %v1383_v6, %v281_v63  ;;  %v288_v63 = vld [vmem:[%s1358_s8 + $0x1d8] sm:$0xff] }
  0x5b   : > { %725 = vst [vmem:[%s1392_s21 + $0x170] sm:$0xff] %v525_v36  ;;  %v532_v36 = vadd.f32 %v1389_v10, %v282_v8  ;;  %v289_v8 = vld [vmem:[%s1358_s8 + $0x1e0] sm:$0xff] }
  0x5c   : > { %726 = vst [vmem:[%s1392_s21 + $0x178] sm:$0xff] %v526_v46  ;;  %v533_v46 = vadd.f32 %v1397_v13, %v283_v18  ;;  %v290_v18 = vld [vmem:[%s1358_s8 + $0x1e8] sm:$0xff] }
  0x5d   : > { %727 = vst [vmem:[%s1392_s21 + $0x180] sm:$0xff] %v527_v54  ;;  %v534_v54 = vadd.f32 %v1401_v15, %v284_v28  ;;  %v291_v28 = vld [vmem:[%s1358_s8 + $0x1f0] sm:$0xff] }
  0x5e   : > { %728 = vst [vmem:[%s1392_s21 + $0x188] sm:$0xff] %v528_v60  ;;  %v535_v60 = vadd.f32 %v1408_v19, %v285_v40  ;;  %v292_v40 = vld [vmem:[%s1358_s8 + $0x1f8] sm:$0xff] }
  0x5f   : > { %729 = vst [vmem:[%s1392_s21 + $0x190] sm:$0xff] %v529_v5  ;;  %v536_v5 = vadd.f32 %v1414_v22, %v286_v49  ;;  %v293_v49 = vld [vmem:[%s1358_s8 + $0x200] sm:$0xff] }
  0x60   : > { %730 = vst [vmem:[%s1392_s21 + $0x198] sm:$0xff] %v530_v14  ;;  %v537_v14 = vadd.f32 %v1418_v24, %v287_v55  ;;  %v294_v55 = vld [vmem:[%s1358_s8 + $0x208] sm:$0xff] }
  0x61   : > { %731 = vst [vmem:[%s1392_s21 + $0x1a0] sm:$0xff] %v531_v26  ;;  %v538_v26 = vadd.f32 %v1424_v27, %v288_v63  ;;  %v295_v63 = vld [vmem:[%s1358_s8 + $0x210] sm:$0xff] }
  0x62   : > { %732 = vst [vmem:[%s1392_s21 + $0x1a8] sm:$0xff] %v532_v36  ;;  %v539_v36 = vadd.f32 %v1430_v30, %v289_v8  ;;  %v296_v8 = vld [vmem:[%s1358_s8 + $0x218] sm:$0xff] }
  0x63   : > { %733 = vst [vmem:[%s1392_s21 + $0x1b0] sm:$0xff] %v533_v46  ;;  %v540_v46 = vadd.f32 %v1434_v32, %v290_v18  ;;  %v297_v18 = vld [vmem:[%s1358_s8 + $0x220] sm:$0xff] }
  0x64   : > { %734 = vst [vmem:[%s1392_s21 + $0x1b8] sm:$0xff] %v534_v54  ;;  %v541_v54 = vadd.f32 %v1440_v35, %v291_v28  ;;  %v298_v28 = vld [vmem:[%s1358_s8 + $0x228] sm:$0xff] }
  0x65   : > { %735 = vst [vmem:[%s1392_s21 + $0x1c0] sm:$0xff] %v535_v60  ;;  %v542_v60 = vadd.f32 %v1446_v38, %v292_v40  ;;  %v299_v40 = vld [vmem:[%s1358_s8 + $0x230] sm:$0xff] }
  0x66   : > { %736 = vst [vmem:[%s1392_s21 + $0x1c8] sm:$0xff] %v536_v5  ;;  %v543_v5 = vadd.f32 %v1452_v41, %v293_v49  ;;  %v300_v49 = vld [vmem:[%s1358_s8 + $0x238] sm:$0xff] }
  0x67   : > { %737 = vst [vmem:[%s1392_s21 + $0x1d0] sm:$0xff] %v537_v14  ;;  %v544_v14 = vadd.f32 %v1458_v44, %v294_v55  ;;  %v301_v55 = vld [vmem:[%s1358_s8 + $0x240] sm:$0xff] }
  0x68   : > { %738 = vst [vmem:[%s1392_s21 + $0x1d8] sm:$0xff] %v538_v26  ;;  %v545_v26 = vadd.f32 %v1464_v47, %v295_v63  ;;  %v302_v63 = vld [vmem:[%s1358_s8 + $0x248] sm:$0xff] }
  0x69   : > { %739 = vst [vmem:[%s1392_s21 + $0x1e0] sm:$0xff] %v539_v36  ;;  %v546_v36 = vadd.f32 %v1470_v50, %v296_v8  ;;  %v303_v8 = vld [vmem:[%s1358_s8 + $0x250] sm:$0xff] }
  0x6a   : > { %740 = vst [vmem:[%s1392_s21 + $0x1e8] sm:$0xff] %v540_v46  ;;  %v547_v46 = vadd.f32 %v1476_v53, %v297_v18  ;;  %v304_v18 = vld [vmem:[%s1358_s8 + $0x258] sm:$0xff] }
  0x6b   : > { %741 = vst [vmem:[%s1392_s21 + $0x1f0] sm:$0xff] %v541_v54  ;;  %v548_v54 = vadd.f32 %v1482_v56, %v298_v28  ;;  %v305_v28 = vld [vmem:[%s1358_s8 + $0x260] sm:$0xff] }
  0x6c   : > { %742 = vst [vmem:[%s1392_s21 + $0x1f8] sm:$0xff] %v542_v60  ;;  %v549_v60 = vadd.f32 %v1488_v59, %v299_v40  ;;  %v306_v40 = vld [vmem:[%s1358_s8 + $0x268] sm:$0xff] }
  0x6d   : > { %743 = vst [vmem:[%s1392_s21 + $0x200] sm:$0xff] %v543_v5  ;;  %v550_v5 = vadd.f32 %v1494_v62, %v300_v49  ;;  %v307_v49 = vld [vmem:[%s1358_s8 + $0x270] sm:$0xff] }
  0x6e   : > { %744 = vst [vmem:[%s1392_s21 + $0x208] sm:$0xff] %v544_v14  ;;  %v551_v14 = vadd.f32 %v1500_v2, %v301_v55  ;;  %v308_v55 = vld [vmem:[%s1358_s8 + $0x278] sm:$0xff] }
  0x6f   : > { %745 = vst [vmem:[%s1392_s21 + $0x210] sm:$0xff] %v545_v26  ;;  %v552_v26 = vadd.f32 %v1506_v7, %v302_v63  ;;  %v309_v63 = vld [vmem:[%s1358_s8 + $0x280] sm:$0xff] }
  0x70   : > { %746 = vst [vmem:[%s1392_s21 + $0x218] sm:$0xff] %v546_v36  ;;  %v553_v36 = vadd.f32 %v1512_v11, %v303_v8  ;;  %v310_v8 = vld [vmem:[%s1358_s8 + $0x288] sm:$0xff] }
  0x71   : > { %747 = vst [vmem:[%s1392_s21 + $0x220] sm:$0xff] %v547_v46  ;;  %v554_v46 = vadd.f32 %v1518_v16, %v304_v18  ;;  %v311_v18 = vld [vmem:[%s1358_s8 + $0x290] sm:$0xff] }
  0x72   : > { %748 = vst [vmem:[%s1392_s21 + $0x228] sm:$0xff] %v548_v54  ;;  %v555_v54 = vadd.f32 %v1524_v20, %v305_v28  ;;  %v312_v28 = vld [vmem:[%s1358_s8 + $0x298] sm:$0xff] }
  0x73   : > { %749 = vst [vmem:[%s1392_s21 + $0x230] sm:$0xff] %v549_v60  ;;  %v556_v60 = vadd.f32 %v1530_v25, %v306_v40  ;;  %v313_v40 = vld [vmem:[%s1358_s8 + $0x2a0] sm:$0xff] }
  0x74   : > { %750 = vst [vmem:[%s1392_s21 + $0x238] sm:$0xff] %v550_v5  ;;  %v557_v5 = vadd.f32 %v1536_v29, %v307_v49  ;;  %v314_v49 = vld [vmem:[%s1358_s8 + $0x2a8] sm:$0xff] }
  0x75   : > { %751 = vst [vmem:[%s1392_s21 + $0x240] sm:$0xff] %v551_v14  ;;  %v558_v14 = vadd.f32 %v1542_v34, %v308_v55  ;;  %v315_v55 = vld [vmem:[%s1358_s8 + $0x2b0] sm:$0xff] }
  0x76   : > { %752 = vst [vmem:[%s1392_s21 + $0x248] sm:$0xff] %v552_v26  ;;  %v559_v26 = vadd.f32 %v1548_v39, %v309_v63  ;;  %v316_v63 = vld [vmem:[%s1358_s8 + $0x2b8] sm:$0xff] }
  0x77   : > { %753 = vst [vmem:[%s1392_s21 + $0x250] sm:$0xff] %v553_v36  ;;  %v560_v36 = vadd.f32 %v1554_v43, %v310_v8  ;;  %v317_v8 = vld [vmem:[%s1358_s8 + $0x2c0] sm:$0xff] }
  0x78   : > { %754 = vst [vmem:[%s1392_s21 + $0x258] sm:$0xff] %v554_v46  ;;  %v561_v46 = vadd.f32 %v1560_v48, %v311_v18  ;;  %v318_v18 = vld [vmem:[%s1358_s8 + $0x2c8] sm:$0xff] }
  0x79   : > { %755 = vst [vmem:[%s1392_s21 + $0x260] sm:$0xff] %v555_v54  ;;  %v562_v54 = vadd.f32 %v1566_v52, %v312_v28  ;;  %v319_v28 = vld [vmem:[%s1358_s8 + $0x2d0] sm:$0xff] }
  0x7a   : > { %756 = vst [vmem:[%s1392_s21 + $0x268] sm:$0xff] %v556_v60  ;;  %v563_v60 = vadd.f32 %v1572_v57, %v313_v40  ;;  %v320_v40 = vld [vmem:[%s1358_s8 + $0x2d8] sm:$0xff] }
  0x7b   : > { %757 = vst [vmem:[%s1392_s21 + $0x270] sm:$0xff] %v557_v5  ;;  %v564_v5 = vadd.f32 %v1578_v61, %v314_v49  ;;  %v321_v49 = vld [vmem:[%s1358_s8 + $0x2e0] sm:$0xff] }
  0x7c   : > { %758 = vst [vmem:[%s1392_s21 + $0x278] sm:$0xff] %v558_v14  ;;  %v565_v14 = vadd.f32 %v1584_v3, %v315_v55  ;;  %v322_v55 = vld [vmem:[%s1358_s8 + $0x2e8] sm:$0xff] }
  0x7d   : > { %759 = vst [vmem:[%s1392_s21 + $0x280] sm:$0xff] %v559_v26  ;;  %v566_v26 = vadd.f32 %v1590_v9, %v316_v63  ;;  %v323_v63 = vld [vmem:[%s1358_s8 + $0x2f0] sm:$0xff] }
  0x7e   : > { %760 = vst [vmem:[%s1392_s21 + $0x288] sm:$0xff] %v560_v36  ;;  %v567_v36 = vadd.f32 %v1596_v17, %v317_v8  ;;  %v324_v8 = vld [vmem:[%s1358_s8 + $0x2f8] sm:$0xff] }
  0x7f   : > { %761 = vst [vmem:[%s1392_s21 + $0x290] sm:$0xff] %v561_v46  ;;  %v568_v46 = vadd.f32 %v1602_v23, %v318_v18  ;;  %v325_v18 = vld [vmem:[%s1358_s8 + $0x300] sm:$0xff] }
  0x80   : > { %762 = vst [vmem:[%s1392_s21 + $0x298] sm:$0xff] %v562_v54  ;;  %v569_v54 = vadd.f32 %v1608_v31, %v319_v28  ;;  %v326_v28 = vld [vmem:[%s1358_s8 + $0x308] sm:$0xff] }
  0x81   : > { %763 = vst [vmem:[%s1392_s21 + $0x2a0] sm:$0xff] %v563_v60  ;;  %v570_v60 = vadd.f32 %v1614_v37, %v320_v40  ;;  %v327_v40 = vld [vmem:[%s1358_s8 + $0x310] sm:$0xff] }
  0x82   : > { %764 = vst [vmem:[%s1392_s21 + $0x2a8] sm:$0xff] %v564_v5  ;;  %v571_v5 = vadd.f32 %v1620_v45, %v321_v49  ;;  %v328_v49 = vld [vmem:[%s1358_s8 + $0x318] sm:$0xff] }
  0x83   : > { %765 = vst [vmem:[%s1392_s21 + $0x2b0] sm:$0xff] %v565_v14  ;;  %v572_v14 = vadd.f32 %v1626_v51, %v322_v55  ;;  %v329_v55 = vld [vmem:[%s1358_s8 + $0x320] sm:$0xff] }
  0x84   : > { %766 = vst [vmem:[%s1392_s21 + $0x2b8] sm:$0xff] %v566_v26  ;;  %v573_v26 = vadd.f32 %v1632_v58, %v323_v63  ;;  %v330_v63 = vld [vmem:[%s1358_s8 + $0x328] sm:$0xff] }
  0x85   : > { %767 = vst [vmem:[%s1392_s21 + $0x2c0] sm:$0xff] %v567_v36  ;;  %v574_v36 = vadd.f32 %v1638_v0, %v324_v8  ;;  %v331_v8 = vld [vmem:[%s1358_s8 + $0x330] sm:$0xff] }
  0x86   : > { %768 = vst [vmem:[%s1392_s21 + $0x2c8] sm:$0xff] %v568_v46  ;;  %v575_v46 = vadd.f32 %v1644_v12, %v325_v18  ;;  %v332_v18 = vld [vmem:[%s1358_s8 + $0x338] sm:$0xff] }
  0x87   : > { %769 = vst [vmem:[%s1392_s21 + $0x2d0] sm:$0xff] %v569_v54  ;;  %v576_v54 = vadd.f32 %v1650_v21, %v326_v28  ;;  %v333_v28 = vld [vmem:[%s1358_s8 + $0x340] sm:$0xff] }
  0x88   : > { %770 = vst [vmem:[%s1392_s21 + $0x2d8] sm:$0xff] %v570_v60  ;;  %v577_v60 = vadd.f32 %v1656_v33, %v327_v40  ;;  %v334_v40 = vld [vmem:[%s1358_s8 + $0x348] sm:$0xff] }
  0x89   : > { %771 = vst [vmem:[%s1392_s21 + $0x2e0] sm:$0xff] %v571_v5  ;;  %v578_v5 = vadd.f32 %v1662_v42, %v328_v49  ;;  %v335_v49 = vld [vmem:[%s1358_s8 + $0x350] sm:$0xff] }
  0x8a   : > { %772 = vst [vmem:[%s1392_s21 + $0x2e8] sm:$0xff] %v572_v14  ;;  %v579_v14 = vadd.f32 %v1374_v1, %v329_v55  ;;  %v336_v55 = vld [vmem:[%s1358_s8 + $0x358] sm:$0xff] }
  0x8b   : > { %773 = vst [vmem:[%s1392_s21 + $0x2f0] sm:$0xff] %v573_v26  ;;  %v580_v26 = vadd.f32 %v1379_v4, %v330_v63  ;;  %v337_v63 = vld [vmem:[%s1358_s8 + $0x360] sm:$0xff] }
  0x8c   : > { %774 = vst [vmem:[%s1392_s21 + $0x2f8] sm:$0xff] %v574_v36  ;;  %v581_v36 = vadd.f32 %v1383_v6, %v331_v8  ;;  %v338_v8 = vld [vmem:[%s1358_s8 + $0x368] sm:$0xff] }
  0x8d   : > { %775 = vst [vmem:[%s1392_s21 + $0x300] sm:$0xff] %v575_v46  ;;  %v582_v46 = vadd.f32 %v1389_v10, %v332_v18  ;;  %v339_v18 = vld [vmem:[%s1358_s8 + $0x370] sm:$0xff] }
  0x8e   : > { %776 = vst [vmem:[%s1392_s21 + $0x308] sm:$0xff] %v576_v54  ;;  %v583_v54 = vadd.f32 %v1397_v13, %v333_v28  ;;  %v340_v28 = vld [vmem:[%s1358_s8 + $0x378] sm:$0xff] }
  0x8f   : > { %777 = vst [vmem:[%s1392_s21 + $0x310] sm:$0xff] %v577_v60  ;;  %v584_v60 = vadd.f32 %v1401_v15, %v334_v40  ;;  %v341_v40 = vld [vmem:[%s1358_s8 + $0x380] sm:$0xff] }
  0x90   : > { %778 = vst [vmem:[%s1392_s21 + $0x318] sm:$0xff] %v578_v5  ;;  %v585_v5 = vadd.f32 %v1408_v19, %v335_v49  ;;  %v342_v49 = vld [vmem:[%s1358_s8 + $0x388] sm:$0xff] }
  0x91   : > { %779 = vst [vmem:[%s1392_s21 + $0x320] sm:$0xff] %v579_v14  ;;  %v586_v14 = vadd.f32 %v1414_v22, %v336_v55  ;;  %v343_v55 = vld [vmem:[%s1358_s8 + $0x390] sm:$0xff] }
  0x92   : > { %780 = vst [vmem:[%s1392_s21 + $0x328] sm:$0xff] %v580_v26  ;;  %v587_v26 = vadd.f32 %v1418_v24, %v337_v63  ;;  %v344_v63 = vld [vmem:[%s1358_s8 + $0x398] sm:$0xff] }
  0x93   : > { %781 = vst [vmem:[%s1392_s21 + $0x330] sm:$0xff] %v581_v36  ;;  %v588_v36 = vadd.f32 %v1424_v27, %v338_v8  ;;  %v345_v8 = vld [vmem:[%s1358_s8 + $0x3a0] sm:$0xff] }
  0x94   : > { %782 = vst [vmem:[%s1392_s21 + $0x338] sm:$0xff] %v582_v46  ;;  %v589_v46 = vadd.f32 %v1430_v30, %v339_v18  ;;  %v346_v18 = vld [vmem:[%s1358_s8 + $0x3a8] sm:$0xff] }
  0x95   : > { %783 = vst [vmem:[%s1392_s21 + $0x340] sm:$0xff] %v583_v54  ;;  %v590_v54 = vadd.f32 %v1434_v32, %v340_v28  ;;  %v347_v28 = vld [vmem:[%s1358_s8 + $0x3b0] sm:$0xff] }
  0x96   : > { %784 = vst [vmem:[%s1392_s21 + $0x348] sm:$0xff] %v584_v60  ;;  %v591_v60 = vadd.f32 %v1440_v35, %v341_v40  ;;  %v348_v40 = vld [vmem:[%s1358_s8 + $0x3b8] sm:$0xff] }
  0x97   : > { %785 = vst [vmem:[%s1392_s21 + $0x350] sm:$0xff] %v585_v5  ;;  %v592_v5 = vadd.f32 %v1446_v38, %v342_v49  ;;  %v349_v49 = vld [vmem:[%s1358_s8 + $0x3c0] sm:$0xff] }
  0x98   : > { %786 = vst [vmem:[%s1392_s21 + $0x358] sm:$0xff] %v586_v14  ;;  %v593_v14 = vadd.f32 %v1452_v41, %v343_v55  ;;  %v350_v55 = vld [vmem:[%s1358_s8 + $0x3c8] sm:$0xff] }
  0x99   : > { %787 = vst [vmem:[%s1392_s21 + $0x360] sm:$0xff] %v587_v26  ;;  %v594_v26 = vadd.f32 %v1458_v44, %v344_v63  ;;  %v351_v63 = vld [vmem:[%s1358_s8 + $0x3d0] sm:$0xff] }
  0x9a   : > { %788 = vst [vmem:[%s1392_s21 + $0x368] sm:$0xff] %v588_v36  ;;  %v595_v36 = vadd.f32 %v1464_v47, %v345_v8  ;;  %v352_v8 = vld [vmem:[%s1358_s8 + $0x3d8] sm:$0xff] }
  0x9b   : > { %789 = vst [vmem:[%s1392_s21 + $0x370] sm:$0xff] %v589_v46  ;;  %v596_v46 = vadd.f32 %v1470_v50, %v346_v18  ;;  %v353_v18 = vld [vmem:[%s1358_s8 + $0x3e0] sm:$0xff] }
  0x9c   : > { %790 = vst [vmem:[%s1392_s21 + $0x378] sm:$0xff] %v590_v54  ;;  %v597_v54 = vadd.f32 %v1476_v53, %v347_v28  ;;  %v354_v28 = vld [vmem:[%s1358_s8 + $0x3e8] sm:$0xff] }
  0x9d   : > { %791 = vst [vmem:[%s1392_s21 + $0x380] sm:$0xff] %v591_v60  ;;  %v598_v60 = vadd.f32 %v1482_v56, %v348_v40  ;;  %v355_v40 = vld [vmem:[%s1358_s8 + $0x3f0] sm:$0xff] }
  0x9e   : > { %792 = vst [vmem:[%s1392_s21 + $0x388] sm:$0xff] %v592_v5  ;;  %v599_v5 = vadd.f32 %v1488_v59, %v349_v49  ;;  %v356_v49 = vld [vmem:[%s1358_s8 + $0x3f8] sm:$0xff] }
  0x9f   : > { %793 = vst [vmem:[%s1392_s21 + $0x390] sm:$0xff] %v593_v14  ;;  %v600_v14 = vadd.f32 %v1494_v62, %v350_v55  ;;  %v357_v55 = vld [vmem:[%s1358_s8 + $0x400] sm:$0xff] }
  0xa0   : > { %794 = vst [vmem:[%s1392_s21 + $0x398] sm:$0xff] %v594_v26  ;;  %v601_v26 = vadd.f32 %v1500_v2, %v351_v63  ;;  %v358_v63 = vld [vmem:[%s1358_s8 + $0x408] sm:$0xff] }
  0xa1   : > { %795 = vst [vmem:[%s1392_s21 + $0x3a0] sm:$0xff] %v595_v36  ;;  %v602_v36 = vadd.f32 %v1506_v7, %v352_v8  ;;  %v359_v8 = vld [vmem:[%s1358_s8 + $0x410] sm:$0xff] }
  0xa2   : > { %796 = vst [vmem:[%s1392_s21 + $0x3a8] sm:$0xff] %v596_v46  ;;  %v603_v46 = vadd.f32 %v1512_v11, %v353_v18  ;;  %v360_v18 = vld [vmem:[%s1358_s8 + $0x418] sm:$0xff] }
  0xa3   : > { %797 = vst [vmem:[%s1392_s21 + $0x3b0] sm:$0xff] %v597_v54  ;;  %v604_v54 = vadd.f32 %v1518_v16, %v354_v28  ;;  %v361_v28 = vld [vmem:[%s1358_s8 + $0x420] sm:$0xff] }
  0xa4   : > { %798 = vst [vmem:[%s1392_s21 + $0x3b8] sm:$0xff] %v598_v60  ;;  %v605_v60 = vadd.f32 %v1524_v20, %v355_v40  ;;  %v362_v40 = vld [vmem:[%s1358_s8 + $0x428] sm:$0xff] }
  0xa5   : > { %799 = vst [vmem:[%s1392_s21 + $0x3c0] sm:$0xff] %v599_v5  ;;  %v606_v5 = vadd.f32 %v1530_v25, %v356_v49  ;;  %v363_v49 = vld [vmem:[%s1358_s8 + $0x430] sm:$0xff] }
  0xa6   : > { %800 = vst [vmem:[%s1392_s21 + $0x3c8] sm:$0xff] %v600_v14  ;;  %v607_v14 = vadd.f32 %v1536_v29, %v357_v55  ;;  %v364_v55 = vld [vmem:[%s1358_s8 + $0x438] sm:$0xff] }
  0xa7   : > { %801 = vst [vmem:[%s1392_s21 + $0x3d0] sm:$0xff] %v601_v26  ;;  %v608_v26 = vadd.f32 %v1542_v34, %v358_v63  ;;  %v365_v63 = vld [vmem:[%s1358_s8 + $0x440] sm:$0xff] }
  0xa8   : > { %802 = vst [vmem:[%s1392_s21 + $0x3d8] sm:$0xff] %v602_v36  ;;  %v609_v36 = vadd.f32 %v1548_v39, %v359_v8  ;;  %v366_v8 = vld [vmem:[%s1358_s8 + $0x448] sm:$0xff] }
  0xa9   : > { %803 = vst [vmem:[%s1392_s21 + $0x3e0] sm:$0xff] %v603_v46  ;;  %v610_v46 = vadd.f32 %v1554_v43, %v360_v18  ;;  %v367_v18 = vld [vmem:[%s1358_s8 + $0x450] sm:$0xff] }
  0xaa   : > { %804 = vst [vmem:[%s1392_s21 + $0x3e8] sm:$0xff] %v604_v54  ;;  %v611_v54 = vadd.f32 %v1560_v48, %v361_v28  ;;  %v368_v28 = vld [vmem:[%s1358_s8 + $0x458] sm:$0xff] }
  0xab   : > { %805 = vst [vmem:[%s1392_s21 + $0x3f0] sm:$0xff] %v605_v60  ;;  %v612_v60 = vadd.f32 %v1566_v52, %v362_v40  ;;  %v369_v40 = vld [vmem:[%s1358_s8 + $0x460] sm:$0xff] }
  0xac   : > { %806 = vst [vmem:[%s1392_s21 + $0x3f8] sm:$0xff] %v606_v5  ;;  %v613_v5 = vadd.f32 %v1572_v57, %v363_v49  ;;  %v370_v49 = vld [vmem:[%s1358_s8 + $0x468] sm:$0xff] }
  0xad   : > { %807 = vst [vmem:[%s1392_s21 + $0x400] sm:$0xff] %v607_v14  ;;  %v614_v14 = vadd.f32 %v1578_v61, %v364_v55  ;;  %v371_v55 = vld [vmem:[%s1358_s8 + $0x470] sm:$0xff] }
  0xae   : > { %808 = vst [vmem:[%s1392_s21 + $0x408] sm:$0xff] %v608_v26  ;;  %v615_v26 = vadd.f32 %v1584_v3, %v365_v63  ;;  %v372_v63 = vld [vmem:[%s1358_s8 + $0x478] sm:$0xff] }
  0xaf   : > { %809 = vst [vmem:[%s1392_s21 + $0x410] sm:$0xff] %v609_v36  ;;  %v616_v36 = vadd.f32 %v1590_v9, %v366_v8  ;;  %v373_v8 = vld [vmem:[%s1358_s8 + $0x480] sm:$0xff] }
  0xb0   : > { %810 = vst [vmem:[%s1392_s21 + $0x418] sm:$0xff] %v610_v46  ;;  %v617_v46 = vadd.f32 %v1596_v17, %v367_v18  ;;  %v374_v18 = vld [vmem:[%s1358_s8 + $0x488] sm:$0xff] }
  0xb1   : > { %811 = vst [vmem:[%s1392_s21 + $0x420] sm:$0xff] %v611_v54  ;;  %v618_v54 = vadd.f32 %v1602_v23, %v368_v28  ;;  %v375_v28 = vld [vmem:[%s1358_s8 + $0x490] sm:$0xff] }
  0xb2   : > { %812 = vst [vmem:[%s1392_s21 + $0x428] sm:$0xff] %v612_v60  ;;  %v619_v60 = vadd.f32 %v1608_v31, %v369_v40  ;;  %v376_v40 = vld [vmem:[%s1358_s8 + $0x498] sm:$0xff] }
  0xb3   : > { %813 = vst [vmem:[%s1392_s21 + $0x430] sm:$0xff] %v613_v5  ;;  %v620_v5 = vadd.f32 %v1614_v37, %v370_v49  ;;  %v377_v49 = vld [vmem:[%s1358_s8 + $0x4a0] sm:$0xff] }
  0xb4   : > { %814 = vst [vmem:[%s1392_s21 + $0x438] sm:$0xff] %v614_v14  ;;  %v621_v14 = vadd.f32 %v1620_v45, %v371_v55  ;;  %v378_v55 = vld [vmem:[%s1358_s8 + $0x4a8] sm:$0xff] }
  0xb5   : > { %815 = vst [vmem:[%s1392_s21 + $0x440] sm:$0xff] %v615_v26  ;;  %v622_v26 = vadd.f32 %v1626_v51, %v372_v63  ;;  %v379_v63 = vld [vmem:[%s1358_s8 + $0x4b0] sm:$0xff] }
  0xb6   : > { %816 = vst [vmem:[%s1392_s21 + $0x448] sm:$0xff] %v616_v36  ;;  %v623_v36 = vadd.f32 %v1632_v58, %v373_v8  ;;  %v380_v8 = vld [vmem:[%s1358_s8 + $0x4b8] sm:$0xff] }
  0xb7   : > { %817 = vst [vmem:[%s1392_s21 + $0x450] sm:$0xff] %v617_v46  ;;  %v624_v46 = vadd.f32 %v1638_v0, %v374_v18  ;;  %v381_v18 = vld [vmem:[%s1358_s8 + $0x4c0] sm:$0xff] }
  0xb8   : > { %818 = vst [vmem:[%s1392_s21 + $0x458] sm:$0xff] %v618_v54  ;;  %v625_v54 = vadd.f32 %v1644_v12, %v375_v28  ;;  %v382_v28 = vld [vmem:[%s1358_s8 + $0x4c8] sm:$0xff] }
  0xb9   : > { %819 = vst [vmem:[%s1392_s21 + $0x460] sm:$0xff] %v619_v60  ;;  %v626_v60 = vadd.f32 %v1650_v21, %v376_v40  ;;  %v383_v40 = vld [vmem:[%s1358_s8 + $0x4d0] sm:$0xff] }
  0xba   : > { %820 = vst [vmem:[%s1392_s21 + $0x468] sm:$0xff] %v620_v5  ;;  %v627_v5 = vadd.f32 %v1656_v33, %v377_v49  ;;  %v384_v49 = vld [vmem:[%s1358_s8 + $0x4d8] sm:$0xff] }
  0xbb   : > { %821 = vst [vmem:[%s1392_s21 + $0x470] sm:$0xff] %v621_v14  ;;  %v628_v14 = vadd.f32 %v1662_v42, %v378_v55  ;;  %v633_v55 = vadd.f32 %v1397_v13, %v383_v40  ;;  %v389_v13 = vld [vmem:[%s1358_s8 + $0x500] sm:$0xff] }
  0xbc   : > { %822 = vst [vmem:[%s1392_s21 + $0x478] sm:$0xff] %v622_v26  ;;  %v629_v26 = vadd.f32 %v1374_v1, %v379_v63  ;;  %v385_v1 = vld [vmem:[%s1358_s8 + $0x4e0] sm:$0xff] }
  0xbd   : > { %823 = vst [vmem:[%s1392_s21 + $0x480] sm:$0xff] %v623_v36  ;;  %v630_v36 = vadd.f32 %v1379_v4, %v380_v8  ;;  %v386_v4 = vld [vmem:[%s1358_s8 + $0x4e8] sm:$0xff]  ;;  %v635_v63 = vadd.f32 %v1408_v19, %v385_v1  ;;  %v391_v19 = vld [vmem:[%s1358_s8 + $0x510] sm:$0xff] }
  0xbe   : > { %824 = vst [vmem:[%s1392_s21 + $0x488] sm:$0xff] %v624_v46  ;;  %v631_v46 = vadd.f32 %v1383_v6, %v381_v18  ;;  %v387_v6 = vld [vmem:[%s1358_s8 + $0x4f0] sm:$0xff]  ;;  %v639_v18 = vadd.f32 %v1430_v30, %v389_v13 }
  0xbf   : > { %825 = vst [vmem:[%s1392_s21 + $0x490] sm:$0xff] %v625_v54  ;;  %v632_v54 = vadd.f32 %v1389_v10, %v382_v28  ;;  %v388_v10 = vld [vmem:[%s1358_s8 + $0x4f8] sm:$0xff]  ;;  %v637_v8 = vadd.f32 %v1418_v24, %v387_v6  ;;  %v393_v24 = vld [vmem:[%s1358_s8 + $0x520] sm:$0xff]  ;;  %v641_v28 = vadd.f32 %v1440_v35, %v391_v19  ;;  %v395_v30 = vld [vmem:[%s1358_s8 + $0x530] sm:$0xff] }
  0xc0   : > { %826 = vst [vmem:[%s1392_s21 + $0x498] sm:$0xff] %v626_v60  ;;  %v634_v60 = vadd.f32 %v1401_v15, %v384_v49  ;;  %v390_v15 = vld [vmem:[%s1358_s8 + $0x508] sm:$0xff]  ;;  %v643_v40 = vadd.f32 %v1452_v41, %v393_v24  ;;  %v397_v35 = vld [vmem:[%s1358_s8 + $0x540] sm:$0xff]  ;;  %v645_v49 = vadd.f32 %v1464_v47, %v395_v30  ;;  %v399_v41 = vld [vmem:[%s1358_s8 + $0x550] sm:$0xff] }
  0xc1   : > { %827 = vst [vmem:[%s1392_s21 + $0x4a0] sm:$0xff] %v627_v5  ;;  %v636_v5 = vadd.f32 %v1414_v22, %v386_v4  ;;  %v392_v22 = vld [vmem:[%s1358_s8 + $0x518] sm:$0xff]  ;;  %v647_v1 = vadd.f32 %v1476_v53, %v397_v35  ;;  %v401_v47 = vld [vmem:[%s1358_s8 + $0x560] sm:$0xff]  ;;  %v649_v4 = vadd.f32 %v1488_v59, %v399_v41  ;;  %v403_v53 = vld [vmem:[%s1358_s8 + $0x570] sm:$0xff] }
  0xc2   : > { %828 = vst [vmem:[%s1392_s21 + $0x4a8] sm:$0xff] %v628_v14  ;;  %v638_v14 = vadd.f32 %v1424_v27, %v388_v10  ;;  %v394_v27 = vld [vmem:[%s1358_s8 + $0x528] sm:$0xff]  ;;  %v651_v6 = vadd.f32 %v1500_v2, %v401_v47  ;;  %v405_v59 = vld [vmem:[%s1358_s8 + $0x580] sm:$0xff]  ;;  %v653_v10 = vadd.f32 %v1512_v11, %v403_v53  ;;  %v407_v2 = vld [vmem:[%s1358_s8 + $0x590] sm:$0xff] }
  0xc3   : > { %829 = vst [vmem:[%s1392_s21 + $0x4b0] sm:$0xff] %v629_v26  ;;  %v640_v26 = vadd.f32 %v1434_v32, %v390_v15  ;;  %v396_v32 = vld [vmem:[%s1358_s8 + $0x538] sm:$0xff]  ;;  %v655_v13 = vadd.f32 %v1524_v20, %v405_v59  ;;  %v409_v11 = vld [vmem:[%s1358_s8 + $0x5a0] sm:$0xff]  ;;  %v657_v15 = vadd.f32 %v1536_v29, %v407_v2  ;;  %v411_v20 = vld [vmem:[%s1358_s8 + $0x5b0] sm:$0xff] }
  0xc4   : > { %830 = vst [vmem:[%s1392_s21 + $0x4b8] sm:$0xff] %v630_v36  ;;  %v642_v36 = vadd.f32 %v1446_v38, %v392_v22  ;;  %v398_v38 = vld [vmem:[%s1358_s8 + $0x548] sm:$0xff]  ;;  %v659_v19 = vadd.f32 %v1548_v39, %v409_v11  ;;  %v413_v29 = vld [vmem:[%s1358_s8 + $0x5c0] sm:$0xff]  ;;  %v661_v22 = vadd.f32 %v1560_v48, %v411_v20  ;;  %v415_v39 = vld [vmem:[%s1358_s8 + $0x5d0] sm:$0xff] }
  0xc5   : > { %831 = vst [vmem:[%s1392_s21 + $0x4c0] sm:$0xff] %v631_v46  ;;  %v644_v46 = vadd.f32 %v1458_v44, %v394_v27  ;;  %v400_v44 = vld [vmem:[%s1358_s8 + $0x558] sm:$0xff]  ;;  %v663_v24 = vadd.f32 %v1572_v57, %v413_v29  ;;  %v417_v48 = vld [vmem:[%s1358_s8 + $0x5e0] sm:$0xff]  ;;  %v665_v27 = vadd.f32 %v1584_v3, %v415_v39  ;;  %v419_v57 = vld [vmem:[%s1358_s8 + $0x5f0] sm:$0xff] }
  0xc6   : > { %832 = vst [vmem:[%s1392_s21 + $0x4c8] sm:$0xff] %v632_v54  ;;  %v646_v54 = vadd.f32 %v1470_v50, %v396_v32  ;;  %v402_v50 = vld [vmem:[%s1358_s8 + $0x568] sm:$0xff]  ;;  %v667_v30 = vadd.f32 %v1596_v17, %v417_v48  ;;  %v421_v32 = vld [vmem:[%s1358_s8 + $0x600] sm:$0xff]  ;;  %v669_v3 = vadd.f32 %v1608_v31, %v419_v57  ;;  %v423_v17 = vld [vmem:[%s1358_s8 + $0x610] sm:$0xff] }
  0xc7   : > { %833 = vst [vmem:[%s1392_s21 + $0x4d0] sm:$0xff] %v633_v55  ;;  %v648_v55 = vadd.f32 %v1482_v56, %v398_v38  ;;  %v404_v56 = vld [vmem:[%s1358_s8 + $0x578] sm:$0xff]  ;;  %v671_v35 = vadd.f32 %v1620_v45, %v421_v32  ;;  %v425_v31 = vld [vmem:[%s1358_s8 + $0x620] sm:$0xff]  ;;  %v673_v38 = vadd.f32 %v1632_v58, %v423_v17  ;;  %v427_v45 = vld [vmem:[%s1358_s8 + $0x630] sm:$0xff] }
  0xc8   : > { %834 = vst [vmem:[%s1392_s21 + $0x4d8] sm:$0xff] %v634_v60  ;;  %v650_v60 = vadd.f32 %v1494_v62, %v400_v44  ;;  %v406_v62 = vld [vmem:[%s1358_s8 + $0x588] sm:$0xff]  ;;  %v428_v41 = vld [vmem:[%s1358_s8 + $0x638] sm:$0xff] }
  0xc9   : > { %835 = vst [vmem:[%s1392_s21 + $0x4e0] sm:$0xff] %v635_v63  ;;  %v652_v63 = vadd.f32 %v1506_v7, %v402_v50  ;;  %v408_v7 = vld [vmem:[%s1358_s8 + $0x598] sm:$0xff] }
  0xca   : > { %836 = vst [vmem:[%s1392_s21 + $0x4e8] sm:$0xff] %v636_v5  ;;  %v654_v5 = vadd.f32 %v1518_v16, %v404_v56  ;;  %v410_v16 = vld [vmem:[%s1358_s8 + $0x5a8] sm:$0xff] }
  0xcb   : > { %837 = vst [vmem:[%s1392_s21 + $0x4f0] sm:$0xff] %v637_v8  ;;  %v656_v8 = vadd.f32 %v1530_v25, %v406_v62  ;;  %v412_v25 = vld [vmem:[%s1358_s8 + $0x5b8] sm:$0xff] }
  0xcc   : > { %838 = vst [vmem:[%s1392_s21 + $0x4f8] sm:$0xff] %v638_v14  ;;  %v658_v14 = vadd.f32 %v1542_v34, %v408_v7  ;;  %v414_v34 = vld [vmem:[%s1358_s8 + $0x5c8] sm:$0xff] }
  0xcd   : > { %839 = vst [vmem:[%s1392_s21 + $0x500] sm:$0xff] %v639_v18  ;;  %v660_v18 = vadd.f32 %v1554_v43, %v410_v16  ;;  %v416_v43 = vld [vmem:[%s1358_s8 + $0x5d8] sm:$0xff] }
  0xce   : > { %840 = vst [vmem:[%s1392_s21 + $0x508] sm:$0xff] %v640_v26  ;;  %v662_v26 = vadd.f32 %v1566_v52, %v412_v25  ;;  %v418_v52 = vld [vmem:[%s1358_s8 + $0x5e8] sm:$0xff] }
  0xcf   : > { %841 = vst [vmem:[%s1392_s21 + $0x510] sm:$0xff] %v641_v28  ;;  %v664_v28 = vadd.f32 %v1578_v61, %v414_v34  ;;  %v420_v61 = vld [vmem:[%s1358_s8 + $0x5f8] sm:$0xff] }
  0xd0   : > { %842 = vst [vmem:[%s1392_s21 + $0x518] sm:$0xff] %v642_v36  ;;  %v666_v36 = vadd.f32 %v1590_v9, %v416_v43  ;;  %v670_v9 = vadd.f32 %v1614_v37, %v420_v61 }
  0xd1   : > { %843 = vst [vmem:[%s1392_s21 + $0x520] sm:$0xff] %v643_v40  ;;  %v668_v40 = vadd.f32 %v1602_v23, %v418_v52  ;;  %v424_v23 = vld [vmem:[%s1358_s8 + $0x618] sm:$0xff] }
  0xd2   : > { %844 = vst [vmem:[%s1392_s21 + $0x528] sm:$0xff] %v644_v46  ;;  %v422_v46 = vld [vmem:[%s1358_s8 + $0x608] sm:$0xff]  ;;  %v674_v37 = vadd.f32 %v1638_v0, %v424_v23  ;;  %v678_v0 = vadd.f32 %v1662_v42, %v428_v41 }
  0xd3   : > { %845 = vst [vmem:[%s1392_s21 + $0x530] sm:$0xff] %v645_v49  ;;  %v672_v49 = vadd.f32 %v1626_v51, %v422_v46  ;;  %v675_v51 = vadd.f32 %v1644_v12, %v425_v31 }
  0xd4   : > { %846 = vst [vmem:[%s1392_s21 + $0x538] sm:$0xff] %v646_v54  ;;  %v426_v54 = vld [vmem:[%s1358_s8 + $0x628] sm:$0xff] }
  0xd5   : > { %847 = vst [vmem:[%s1392_s21 + $0x540] sm:$0xff] %v647_v1  ;;  %v676_v58 = vadd.f32 %v1650_v21, %v426_v54  ;;  %v677_v1 = vadd.f32 %v1656_v33, %v427_v45 }
  0xd6   : > { %848 = vst [vmem:[%s1392_s21 + $0x548] sm:$0xff] %v648_v55 }
  0xd7   : > { %849 = vst [vmem:[%s1392_s21 + $0x550] sm:$0xff] %v649_v4 }
  0xd8   : > { %850 = vst [vmem:[%s1392_s21 + $0x558] sm:$0xff] %v650_v60 }
  0xd9   : > { %851 = vst [vmem:[%s1392_s21 + $0x560] sm:$0xff] %v651_v6 }
  0xda   : > { %852 = vst [vmem:[%s1392_s21 + $0x568] sm:$0xff] %v652_v63 }
  0xdb   : > { %853 = vst [vmem:[%s1392_s21 + $0x570] sm:$0xff] %v653_v10 }
  0xdc   : > { %854 = vst [vmem:[%s1392_s21 + $0x578] sm:$0xff] %v654_v5 }
  0xdd   : > { %855 = vst [vmem:[%s1392_s21 + $0x580] sm:$0xff] %v655_v13 }
  0xde   : > { %856 = vst [vmem:[%s1392_s21 + $0x588] sm:$0xff] %v656_v8 }
  0xdf   : > { %857 = vst [vmem:[%s1392_s21 + $0x590] sm:$0xff] %v657_v15 }
  0xe0   : > { %858 = vst [vmem:[%s1392_s21 + $0x598] sm:$0xff] %v658_v14 }
  0xe1   : > { %859 = vst [vmem:[%s1392_s21 + $0x5a0] sm:$0xff] %v659_v19 }
  0xe2   : > { %860 = vst [vmem:[%s1392_s21 + $0x5a8] sm:$0xff] %v660_v18 }
  0xe3   : > { %861 = vst [vmem:[%s1392_s21 + $0x5b0] sm:$0xff] %v661_v22 }
  0xe4   : > { %862 = vst [vmem:[%s1392_s21 + $0x5b8] sm:$0xff] %v662_v26 }
  0xe5   : > { %863 = vst [vmem:[%s1392_s21 + $0x5c0] sm:$0xff] %v663_v24 }
  0xe6   : > { %864 = vst [vmem:[%s1392_s21 + $0x5c8] sm:$0xff] %v664_v28 }
  0xe7   : > { %865 = vst [vmem:[%s1392_s21 + $0x5d0] sm:$0xff] %v665_v27 }
  0xe8   : > { %866 = vst [vmem:[%s1392_s21 + $0x5d8] sm:$0xff] %v666_v36 }
  0xe9   : > { %867 = vst [vmem:[%s1392_s21 + $0x5e0] sm:$0xff] %v667_v30 }
  0xea   : > { %868 = vst [vmem:[%s1392_s21 + $0x5e8] sm:$0xff] %v668_v40 }
  0xeb   : > { %869 = vst [vmem:[%s1392_s21 + $0x5f0] sm:$0xff] %v669_v3 }
  0xec   : > { %870 = vst [vmem:[%s1392_s21 + $0x5f8] sm:$0xff] %v670_v9 }
  0xed   : > { %871 = vst [vmem:[%s1392_s21 + $0x600] sm:$0xff] %v671_v35 }
  0xee   : > { %872 = vst [vmem:[%s1392_s21 + $0x608] sm:$0xff] %v672_v49 }
  0xef   : > { %873 = vst [vmem:[%s1392_s21 + $0x610] sm:$0xff] %v673_v38 }
  0xf0   : > { %874 = vst [vmem:[%s1392_s21 + $0x618] sm:$0xff] %v674_v37 }
  0xf1   : > { %875 = vst [vmem:[%s1392_s21 + $0x620] sm:$0xff] %v675_v51 }
  0xf2   : > { %876 = vst [vmem:[%s1392_s21 + $0x628] sm:$0xff] %v676_v58 }
  0xf3   : > { %877 = vst [vmem:[%s1392_s21 + $0x630] sm:$0xff] %v677_v1 }
  0xf4   : > { %878 = vst [vmem:[%s1392_s21 + $0x638] sm:$0xff] %v678_v0 }
  0xf5   : > { %1187 = shalt.err (!%p1184_p13)
}
  0xf6   : > { %s1251_s5 = smov 6400   ;;  %s1252_s25 = smov 12800  }
  0xf7   : > { %s1253_s27 = smov 400  }
  0xf8   : > { %1031 = dma.vmem_to_hbm [thread:$0]  (%p1320_p9), %s895_s19, 25600, %s897_s20, %s880_s29, %s1251_s5, %s1252_s25, %s1253_s27  }
  0xf9 PF: > { %s911_s28 = sand.u32 1, %s1226_s9   ;;  %p1041_p0 = pnand %p1013_p12, %p1327_p11 }
  0xfa   : > { %s912_s21 = scalar_lea.sflag [#allocation4], %s911_s28 }
  0xfb   : > { %p1042_p1 = pneg %p1041_p0 }
  0xfd   : > { %1221 = dma.done.wait (%p1042_p1), %s912_s21, 25600  }
  0xfe   : > { %1223 = vsyncadd (%p1042_p1), %s912_s21, 4294941696  ;;  %s21_s14 = sadd.s32 1, %s1246_s14   ;;  %s2171_s9 = smov %s1230_s10 }
  0xff   : > { %p18_p2 = scmp.ge.s32.totalorder %s21_s14, 4   ;;  %s2172_s10 = smov %s1234_s11 }
 0x100   : > { %s2173_s11 = smov %s1325_s23  ;;  %s2174_s12 = smov %s1242_s13 }
 0x101   : > { %s2175_s13 = smov %s2177_s17  ;;  %20 = sbr.rel (!%p18_p2) target bundleno = 8 (0x8), region = 86 }
 0x106   :  { %918 = vsyncpa [#allocation3], 1 }
 0x107   :  { %920 = vsyncpa [#allocation3 + $0x1], 1 }
 0x108   :  { %921 = vsyncpa [#allocation6], 1 }
 0x109   :  { %923 = vsyncpa [#allocation6 + $0x1], 1 }
 0x10a   :  { %924 = vsyncpa [#allocation4], 1 }
 0x10b   :  { %926 = vsyncpa [#allocation4 + $0x1], 1 }

</bundles_post_ra>
